<compile_context>
chip_gen: v6e
topology: v6e:2x2x1
jax: 0.10.0
libtpu: 0.0.40
codegen_flags: <defaults>
</compile_context>

<pallas_src>
import functools

import jax
import jax.numpy as jnp
from jax import lax
from jax.experimental import pallas as pl
from jax.experimental.pallas import tpu as pltpu


# Per-buffer block budget: in-block + out-block, double-buffered by the Pallas
# pipeline, stays <= 16 MiB.  That fits the scoped-VMEM defaults on v5e
# (16 MiB) and v6e/v7x (32 MiB); the explicit 32 MiB limit adds headroom and is
# safe on all three generations (physical VMEM 128 / 128 / 64 MiB).
_BLOCK_BUDGET = 4 * 1024 * 1024
_VMEM_LIMIT = 32 * 1024 * 1024


def _sublane_multiple(dtype):
    return {4: 8, 2: 16, 1: 32}.get(jnp.dtype(dtype).itemsize, 8)


def _divisor_tile(n, max_tile, multiple):
    """Largest divisor of n that is a multiple of `multiple` and <= max_tile.

    Returns n (the full dim) if n <= max_tile or if no aligned divisor exists.
    """
    if n <= max_tile:
        return n
    t = (max_tile // multiple) * multiple
    while t >= multiple:
        if n % t == 0:
            return t
        t -= multiple
    return n


# ----------------------------------------------------------------------------- kernels
def _copy_kernel(x_ref, o_ref):
    # The transpose is expressed entirely by the output BlockSpec index_map;
    # the body is a straight lane-dense VMEM copy.
    o_ref[...] = x_ref[...]


def _transpose_last2_kernel(x_ref, o_ref, *, n_lead, bl):
    # Swap of the last two (sublane, lane) dims of the block: 2-D transpose on
    # the XLU, looped over the packed leading-dim chunk (bl) of the block.
    if n_lead == 0:
        o_ref[...] = jnp.swapaxes(x_ref[...], 0, 1)
        return
    lead = (0,) * (n_lead - 1)

    def body(b, carry):
        o_ref[lead + (b,)] = jnp.swapaxes(x_ref[lead + (b,)], 0, 1)
        return carry

    lax.fori_loop(0, bl, body, 0, unroll=True)


def _swap_lead_with_sublane_kernel(x_ref, o_ref, *, d1, ndim, s_size):
    # x block: (..1.., tl @ d1, ..1.., S, C);  o block: (..1.., S @ d1, ..1.., tl, C)
    # Loop over S writing lane/sublane-dense (tl, C) slabs of the output block:
    # dense vst (single store slot on v5e), strided loads are comparatively cheap.
    def body(s, carry):
        src = tuple(
            slice(None) if a in (d1, ndim - 1) else (s if a == ndim - 2 else 0)
            for a in range(ndim))
        dst = tuple(
            slice(None) if a in (ndim - 2, ndim - 1) else (s if a == d1 else 0)
            for a in range(ndim))
        o_ref[dst] = x_ref[src]
        return carry

    lax.fori_loop(0, s_size, body, 0, unroll=True)


def _general_swap_kernel(x_ref, o_ref, *, a1, a2):
    # TODO(synk): rare path (lane axis swapped with a distant major axis);
    # relies on Mosaic's general transpose lowering over a full trailing slab.
    # Decompose into tiled 2-D transposes / bound VMEM if ever hit at large
    # sizes or with packed (bf16/int8) dtypes.
    o_ref[...] = jnp.swapaxes(x_ref[...], a1, a2)


# ----------------------------------------------------------------------------- wrapper
def pallas_transpose(x, dim1, dim2):
    """Pallas TPU equivalent of torch.Tensor.transpose(dim1, dim2)."""
    ndim = x.ndim
    if ndim == 0:
        return x
    d1, d2 = dim1 % ndim, dim2 % ndim
    if d1 == d2:
        return x
    if d1 > d2:
        d1, d2 = d2, d1

    shape = x.shape
    itemsize = jnp.dtype(x.dtype).itemsize
    out_shape = list(shape)
    out_shape[d1], out_shape[d2] = out_shape[d2], out_shape[d1]
    out_shape = tuple(out_shape)

    if d2 <= ndim - 3:
        # --- Path A: both swapped axes lie outside the tiled (last two) dims.
        # Pure lane-dense copy; the permutation lives entirely in the output
        # index_map.  Untouched axes get as much extent as fits the per-block
        # budget so each grid step DMAs a large slab (amortizes the ~0.35 us
        # per-step overhead).
        block = [1] * ndim
        block[ndim - 1] = shape[ndim - 1]
        block[ndim - 2] = shape[ndim - 2]
        blk_bytes = itemsize * shape[ndim - 1] * shape[ndim - 2]
        # TODO(synk): if the trailing (sublane, lane) plane alone exceeds the
        # budget, additionally tile axis ndim-2; not needed at these sizes.
        for a in range(ndim - 3, -1, -1):
            if a in (d1, d2):
                continue
            if blk_bytes * shape[a] <= _BLOCK_BUDGET:
                block[a] = shape[a]
                blk_bytes *= shape[a]
        grid_axes = tuple(a for a in range(ndim)
                          if a in (d1, d2) or shape[a] // block[a] > 1)
        grid = tuple(shape[a] // block[a] for a in grid_axes)

        def in_map(*g, _axes=grid_axes):
            blk = [0] * ndim
            for gi, a in zip(g, _axes):
                blk[a] = gi
            return tuple(blk)

        def out_map(*g, _axes=grid_axes):
            blk = [0] * ndim
            for gi, a in zip(g, _axes):
                blk[a] = gi
            blk[d1], blk[d2] = blk[d2], blk[d1]
            return tuple(blk)

        kernel = _copy_kernel
        in_spec = pl.BlockSpec(tuple(block), in_map)
        out_spec = pl.BlockSpec(tuple(block), out_map)

    elif d1 == ndim - 2:
        # --- Path B: swapping the last two dims -> tiled 2-D transpose.
        R, C = shape[-2], shape[-1]
        n_lead = ndim - 2
        # Each tile dim appears as the lane dim of one of the two blocks, so
        # any non-full tile must be a multiple of 128.  Cap at 1024 / budget.
        max_t = min(1024, max(128, int((_BLOCK_BUDGET // itemsize) ** 0.5)))
        tr = _divisor_tile(R, max_t, 128)
        tc = _divisor_tile(C, max_t, 128)
        # Pack several leading entries per block when the (R, C) tile is small,
        # so each step still moves a sizeable slab — but keep >= 2 grid steps
        # when possible so both TensorCores (v7x megacore) get work.
        bl = 1
        if n_lead >= 1:
            n_last_lead = shape[n_lead - 1]
            max_bl = max(1, _BLOCK_BUDGET // max(1, tr * tc * itemsize))
            rest_grid = (R // tr) * (C // tc)
            for a in range(n_lead - 1):
                rest_grid *= shape[a]
            if rest_grid == 1 and n_last_lead >= 2:
                max_bl = min(max_bl, max(1, n_last_lead // 2))
            bl = _divisor_tile(n_last_lead, min(max_bl, n_last_lead), 1)

        grid = tuple(shape[a] for a in range(n_lead - 1))
        if n_lead >= 1:
            grid += (shape[n_lead - 1] // bl,)
        grid += (R // tr, C // tc)

        lead_blk = (1,) * max(0, n_lead - 1) + ((bl,) if n_lead >= 1 else ())
        blk_in = lead_blk + (tr, tc)
        blk_out = lead_blk + (tc, tr)

        def in_map(*g):
            return g

        def out_map(*g):
            return g[:-2] + (g[-1], g[-2])

        kernel = functools.partial(_transpose_last2_kernel, n_lead=n_lead, bl=bl)
        in_spec = pl.BlockSpec(blk_in, in_map)
        out_spec = pl.BlockSpec(blk_out, out_map)

    elif d2 == ndim - 2:
        # --- Path C: a leading axis swapped with the sublane axis, e.g.
        # (B, L, H, dh).transpose(1, 2).  Tile the leading swapped axis so
        # VMEM stays bounded at realistic sizes; the kernel loops over the
        # sublane-source axis writing dense (tl, C) output slabs.
        R = shape[d1]            # leading swapped axis (e.g. L)
        S = shape[ndim - 2]      # sublane swapped axis (e.g. H)
        C = shape[ndim - 1]
        p = _sublane_multiple(x.dtype)
        max_tl = max(p, _BLOCK_BUDGET // max(1, S * C * itemsize))
        tl = _divisor_tile(R, max_tl, p)

        grid_axes = tuple(a for a in range(ndim - 2) if a == d1 or shape[a] > 1)
        grid = tuple((R // tl) if a == d1 else shape[a] for a in grid_axes)

        blk_in = tuple(
            ((tl if a == d1 else 1) if a < ndim - 2 else shape[a])
            for a in range(ndim))
        blk_out = [1] * ndim
        blk_out[d1] = S
        blk_out[ndim - 2] = tl
        blk_out[ndim - 1] = C
        blk_out = tuple(blk_out)

        def in_map(*g, _axes=grid_axes):
            blk = [0] * ndim
            for gi, a in zip(g, _axes):
                blk[a] = gi
            return tuple(blk)

        def out_map(*g, _axes=grid_axes):
            blk = [0] * ndim
            for gi, a in zip(g, _axes):
                blk[a] = gi
            blk[ndim - 2] = blk[d1]     # tile index along d1 moves to axis ndim-2
            blk[d1] = 0
            return tuple(blk)

        kernel = functools.partial(_swap_lead_with_sublane_kernel,
                                   d1=d1, ndim=ndim, s_size=S)
        in_spec = pl.BlockSpec(blk_in, in_map)
        out_spec = pl.BlockSpec(blk_out, out_map)

    else:
        # --- Path D (rare): lane axis swapped with a distant major axis.
        grid_axes = tuple(a for a in range(ndim - 2) if a != d1 and shape[a] > 1)
        grid = tuple(shape[a] for a in grid_axes) if grid_axes else (1,)

        blk_in = tuple(shape[a] if a in (d1, ndim - 2, ndim - 1) else 1
                       for a in range(ndim))
        blk_out = tuple(out_shape[a] if a in (d1, ndim - 2, ndim - 1) else 1
                        for a in range(ndim))

        def io_map(*g, _axes=grid_axes):
            blk = [0] * ndim
            for gi, a in zip(g, _axes):
                blk[a] = gi
            return tuple(blk)

        kernel = functools.partial(_general_swap_kernel, a1=d1, a2=ndim - 1)
        in_spec = pl.BlockSpec(blk_in, io_map)
        out_spec = pl.BlockSpec(blk_out, io_map)

    return pl.pallas_call(
        kernel,
        out_shape=jax.ShapeDtypeStruct(out_shape, x.dtype),
        grid=grid,
        in_specs=[in_spec],
        out_specs=out_spec,
        compiler_params=pltpu.CompilerParams(
            dimension_semantics=("parallel",) * len(grid),
            vmem_limit_bytes=_VMEM_LIMIT),
        cost_estimate=pl.CostEstimate(
            flops=0, transcendentals=0,
            bytes_accessed=2 * x.size * itemsize),
    )(x)


class Transpose:
    """Mirror of the PyTorch module: Transpose(dim1, dim2)(x) == x.transpose(dim1, dim2)."""

    def __init__(self, dim1, dim2):
        self.dim1, self.dim2 = dim1, dim2

    def __call__(self, x):
        return pallas_transpose(x, self.dim1, self.dim2)


# ----------------------------------------------------------------------------- demo
if __name__ == "__main__":
    key = jax.random.PRNGKey(0)
    k1, k2, k3 = jax.random.split(key, 3)

    # (a) Transpose(1, 2) on a (bs, L, d_model) tensor -> swap of the last two
    #     dims (Path B: tiled 2-D transpose, leading entries kept as parallel grid).
    x3 = jax.random.normal(k1, (2, 16, 128), dtype=jnp.float32)
    y3 = jax.block_until_ready(Transpose(1, 2)(x3))
    assert y3.shape == (2, 128, 16)
    assert jnp.array_equal(y3, jnp.swapaxes(x3, 1, 2))

    # (b) Transpose(1, 2) on a (bs, L, H, dh) head tensor -> leading<->sublane
    #     swap (Path C: L tiled into the grid, dense-slab writes per head).
    x4 = jax.random.normal(k2, (2, 16, 8, 128), dtype=jnp.float32)
    y4 = jax.block_until_ready(Transpose(1, 2)(x4))
    assert y4.shape == (2, 8, 16, 128)
    assert jnp.array_equal(y4, jnp.swapaxes(x4, 1, 2))

    # (c) Transpose(1, 2) on a 5-D tensor where both axes are outside the tiled
    #     dims -> pure copy with swapped index maps (Path A, large slabs).
    x5 = jax.random.normal(k3, (2, 3, 4, 8, 128), dtype=jnp.float32)
    y5 = jax.block_until_ready(Transpose(1, 2)(x5))
    assert y5.shape == (2, 4, 3, 8, 128)
    assert jnp.array_equal(y5, jnp.swapaxes(x5, 1, 2))

    print("KERNEL_OK")
</pallas_src>

<mosaic_0001>
module attributes {stable_mosaic.version = 11 : i64} {
  func.func @_transpose_last2_kernel(%arg0: i32, %arg1: i32, %arg2: i32, %arg3: memref<1x16x128xf32, #tpu.memory_space<vmem>>, %arg4: memref<1x128x16xf32, #tpu.memory_space<vmem>>) attributes {dimension_semantics = [#tpu.dimension_semantics<parallel>, #tpu.dimension_semantics<parallel>, #tpu.dimension_semantics<parallel>], iteration_bounds = array<i64: 2, 1, 1>, scalar_prefetch = 0 : i64, scratch_operands = 0 : i64, tpu.core_type = #tpu.core_type<tc>, window_params = [{transform_indices = @transform_0, window_bounds = array<i64: 1, 16, 128>}, {transform_indices = @transform_1, window_bounds = array<i64: 1, 128, 16>}]} {
    %c0_i32 = arith.constant 0 : i32
    %0 = arith.index_cast %c0_i32 : i32 to index
    %c0 = arith.constant 0 : index
    %c0_0 = arith.constant 0 : index
    %1 = vector.load %arg3[%0, %c0, %c0_0] : memref<1x16x128xf32, #tpu.memory_space<vmem>>, vector<1x16x128xf32>
    %2 = vector.shape_cast %1 : vector<1x16x128xf32> to vector<16x128xf32>
    %3 = tpu.transpose %2, [1, 0] : vector<16x128xf32> -> vector<128x16xf32>
    %4 = arith.index_cast %c0_i32 : i32 to index
    %c0_1 = arith.constant 0 : index
    %c0_2 = arith.constant 0 : index
    %5 = vector.load %arg4[%4, %c0_1, %c0_2] : memref<1x128x16xf32, #tpu.memory_space<vmem>>, vector<1x128x16xf32>
    %6 = vector.shape_cast %5 : vector<1x128x16xf32> to vector<128x16xf32>
    %7 = vector.shape_cast %3 : vector<128x16xf32> to vector<1x128x16xf32>
    tpu.vector_store %arg4[%4, %c0_1, %c0_2], %7 {strides = array<i32>} : memref<1x128x16xf32, #tpu.memory_space<vmem>>, vector<1x128x16xf32>,
    %c1_i32 = arith.constant 1 : i32
    return
  }
  func.func @transform_0(%arg0: i32, %arg1: i32, %arg2: i32) -> (i32, i32, i32) {
    %c0_i32 = arith.constant 0 : i32
    return %arg0, %arg1, %arg2 : i32, i32, i32
  }
  func.func @transform_1(%arg0: i32, %arg1: i32, %arg2: i32) -> (i32, i32, i32) {
    %c0_i32 = arith.constant 0 : i32
    return %arg0, %arg2, %arg1 : i32, i32, i32
  }
}

</mosaic_0001>

<bundles_post_ra>
// kernel: tpu_custom_call.1
= control target key start
LH: loop header
LB: loop body
LE: loop exit
PB: predicated region body
PF: predicated region fallthrough
CT: control target
= control target key end

     0   :  { %6 = vsyncpa [#allocation3], 0  ;;  %s639_s0 = inlined_call_operand.hbm [shape: f32[2,16,128], index: 0, kind: input, shape index: {}]   ;;  %s640_s1 = inlined_call_operand.vmem [shape: f32[2,128,16], index: 1, kind: output, shape index: {}]  }
   0x1   :  { %8 = vsyncpa [#allocation3 + $0x1], 0  ;;  %s509_s6 = smov 0   ;;  %s511_s7 = smov 0  }
   0x2   :  { %s513_s8 = smov 0   ;;  %s515_s9 = smov 0  }
   0x3   :  { %s517_s10 = smov 0   ;;  %s519_s11 = smov 0  }
   0x4 LB: > { %s343_s12 = sadd.s32 4294967295, %s494_s11   ;;  %s33_s13 = sadd.s32 1, %s490_s10  ;;  %s494_s11 = sphi %s519_s11, %s14_s11   ;;  %s490_s10 = sphi %s517_s10, %s648_s10   ;;  %s486_s9 = sphi %s515_s9, %s647_s9   ;;  %s482_s8 = sphi %s513_s8, %s646_s8   ;;  %s478_s7 = sphi %s511_s7, %s645_s7   ;;  %s474_s6 = sphi %s509_s6, %s644_s6  }
   0x5   : > { %p35_p0 = scmp.ge.s32.totalorder %s33_s13, 2  ;;  %s44_s14 = sadd.s32 1, %s482_s8 }
   0x6   : > { %p51_p1 = scmp.ne.s32.totalorder %s482_s8, %s478_s7  ;;  %p52_p2 = scmp.eq.s32.totalorder %s494_s11, 0 }
   0x7   : > { %s650_s13 = smov (%p35_p0, %s33_s13), 0  ;;  %p57_p4 = scmp.ne.s32.totalorder %s478_s7, %s474_s6 }
   0x8   : > { %p545_p3 = por %p52_p2, %p51_p1  ;;  %s37_s16 = ssub.s32 %s490_s10, %s650_s13 }
   0x9   : > { %p58_p5 = scmp.eq.s32.totalorder %s343_s12, 0  ;;  %p42_p6 = scmp.eq.s32.totalorder %s37_s16, 0 }
   0xa   : > { %p364_p8 = scmp.lt.s32.totalorder %s494_s11, 2  ;;  %s111_s19 = sand.u32 1, %s482_s8  }
   0xb   : > { %p552_p7 = por %p58_p5, %p57_p4  ;;  %s356_s20 = sshll.u32 %s490_s10, 8 }
   0xc   : > { %s558_s18 = scalar_select %p42_p6, %s482_s8, %s44_s14  }
   0xd   : > { %s347_s21 = sshll.u32 %s111_s19, 4  ;;  %s124_s24 = scalar_lea.hbm %s639_s0, %s356_s20 }
   0xe   : > { %s115_s25 = scalar_lea.vmem [#allocation2], %s347_s21  ;;  %p567_p9 = pnand %p364_p8, %p545_p3 }
   0xf   : > { %s125_s26 = sshll.u32 %s115_s25, 4  ;;  %s112_s28 = scalar_lea.sflag [#allocation3], %s111_s19  ;;  %s126_s26 = int_to_ptr.vmem [resolvable:$true] %s125_s26 }
  0x10   : > { %p418_p10 = pneg %p567_p9  ;;  %s429_s29 = scalar_lea.vmem %s126_s26, 256 }
  0x11   : > { %p430_p11 = scmp.ne.s32.totalorder %s126_s26, %s429_s29  ;;  %s496_s30 = smov [#allocation2]  }
  0x12   : > { %s434_s2 = sshll.u32 %s496_s30, 4  ;;  %s435_s2 = int_to_ptr.vmem [resolvable:$false] %s434_s2 }
  0x13   : > { %p432_p12 = pnand %p430_p11, %p418_p10  ;;  %s436_s3 = scalar_lea.vmem %s435_s2, 512 }
  0x14   : > { %p437_p0 = scmp.lt.s32.totalorder %s126_s26, %s435_s2  ;;  %p438_p1 = scmp.lt.s32.totalorder %s436_s3, %s429_s29 }
  0x15   : > { %p433_p13 = pneg %p432_p12 }
  0x16   : > { %p439_p2 = por %p438_p1, %p437_p0 }
  0x18   : > { %p440_p3 = pnand %p439_p2, %p433_p13 }
  0x1a   : > { %443 = shalt.err (!%p440_p3)
}
  0x1b   : > { %s497_s4 = smov 128   ;;  %s498_s5 = smov 8  }
  0x1c   : > { %363 = dma.hbm_to_vmem [thread:$0]  (!%p567_p9), %s124_s24, 256, %s126_s26, %s112_s28, %s497_s4, %s497_s4, %s498_s5  }
  0x1d   : > { %p350_p4 = scmp.ge.s32.totalorder %s494_s11, 1  ;;  %p133_p5 = scmp.lt.s32.totalorder %s494_s11, 3 }
  0x1f   : > { %p134_p6 = pnand %p350_p4, %p133_p5 }
  0x20   : > { %s139_s6 = sand.u32 (!%p134_p6), 1, %s478_s7  }
  0x21   : > { %137 = sbr.rel (%p134_p6) target bundleno = 226 (0xe2), region = 24  ;;  %s351_s12 = sshll.u32 (!%p134_p6), %s139_s6, 4 }
  0x22   : > { %s140_s14 = scalar_lea.sflag (!%p134_p6), [#allocation3], %s139_s6  ;;  %s143_s15 = scalar_lea.vmem (!%p134_p6), [#allocation2], %s351_s12 }
  0x26   : > { %469 = dma.done.wait (%p552_p7), %s140_s14, 256  }
  0x27   : > { %471 = vsyncadd (%p552_p7), %s140_s14, 4294967040  ;;  %v183_v0 = vld [vmem:[%s143_s15] sm:$0xff]  ;;  %v184_v1 = vld [vmem:[%s143_s15 + $0x8] sm:$0xff]  ;;  %p171_p8 = scmp.lt.s32.totalorder %s486_s9, 1  ;;  %vm217_vm0 = vcmask 130048  }
  0x28   : > { %185 = vxpose.xlu0.b32.start [1/2] (short) %v183_v0, 128 }
  0x29   : > { %s652_s9 = smov (!%p171_p8, %s486_s9), 1 }
  0x2a   : > { %s357_s16 = sshll.u32 %s652_s9, 7 }
  0x2b   : > { %s587_s21 = scalar_lea.vmem %s640_s1, %s357_s16 }
  0x2c   : > { %186 = vxpose.xlu0.b32.end [2/2] (short) %v184_v1, 128 }
  0xa4   : > { %v201_v2 = vpop.trf.xlu0 }
  0xa5   : > { %218 = vst.msk [vmem:[%s587_s21] sm:$0xff] %vm217_vm0, %v201_v2 }
  0xa8   : > { %v202_v3 = vpop.trf.xlu0 }
  0xa9   : > { %219 = vst.msk [vmem:[%s587_s21 + $0x8] sm:$0xff] %vm217_vm0, %v202_v3 }
  0xac   : > { %v203_v4 = vpop.trf.xlu0 }
  0xad   : > { %220 = vst.msk [vmem:[%s587_s21 + $0x10] sm:$0xff] %vm217_vm0, %v203_v4 }
  0xb0   : > { %v204_v5 = vpop.trf.xlu0 }
  0xb1   : > { %221 = vst.msk [vmem:[%s587_s21 + $0x18] sm:$0xff] %vm217_vm0, %v204_v5 }
  0xb4   : > { %v205_v6 = vpop.trf.xlu0 }
  0xb5   : > { %222 = vst.msk [vmem:[%s587_s21 + $0x20] sm:$0xff] %vm217_vm0, %v205_v6 }
  0xb8   : > { %v206_v7 = vpop.trf.xlu0 }
  0xb9   : > { %223 = vst.msk [vmem:[%s587_s21 + $0x28] sm:$0xff] %vm217_vm0, %v206_v7 }
  0xbc   : > { %v207_v8 = vpop.trf.xlu0 }
  0xbd   : > { %224 = vst.msk [vmem:[%s587_s21 + $0x30] sm:$0xff] %vm217_vm0, %v207_v8 }
  0xc0   : > { %v208_v9 = vpop.trf.xlu0 }
  0xc1   : > { %225 = vst.msk [vmem:[%s587_s21 + $0x38] sm:$0xff] %vm217_vm0, %v208_v9 }
  0xc4   : > { %v209_v10 = vpop.trf.xlu0 }
  0xc5   : > { %226 = vst.msk [vmem:[%s587_s21 + $0x40] sm:$0xff] %vm217_vm0, %v209_v10 }
  0xc8   : > { %v210_v11 = vpop.trf.xlu0 }
  0xc9   : > { %227 = vst.msk [vmem:[%s587_s21 + $0x48] sm:$0xff] %vm217_vm0, %v210_v11 }
  0xcc   : > { %v211_v12 = vpop.trf.xlu0 }
  0xcd   : > { %228 = vst.msk [vmem:[%s587_s21 + $0x50] sm:$0xff] %vm217_vm0, %v211_v12 }
  0xd0   : > { %v212_v13 = vpop.trf.xlu0 }
  0xd1   : > { %229 = vst.msk [vmem:[%s587_s21 + $0x58] sm:$0xff] %vm217_vm0, %v212_v13 }
  0xd4   : > { %v213_v14 = vpop.trf.xlu0 }
  0xd5   : > { %230 = vst.msk [vmem:[%s587_s21 + $0x60] sm:$0xff] %vm217_vm0, %v213_v14 }
  0xd8   : > { %v214_v15 = vpop.trf.xlu0 }
  0xd9   : > { %231 = vst.msk [vmem:[%s587_s21 + $0x68] sm:$0xff] %vm217_vm0, %v214_v15 }
  0xdc   : > { %v215_v16 = vpop.trf.xlu0 }
  0xdd   : > { %232 = vst.msk [vmem:[%s587_s21 + $0x70] sm:$0xff] %vm217_vm0, %v215_v16 }
  0xe0   : > { %v216_v17 = vpop.trf.xlu0 }
  0xe1   : > { %233 = vst.msk [vmem:[%s587_s21 + $0x78] sm:$0xff] %vm217_vm0, %v216_v17 }
  0xe2 PF: > { %s14_s11 = sadd.s32 1, %s494_s11   ;;  %s644_s6 = smov %s478_s7 }
  0xe3   : > { %p11_p7 = scmp.ge.s32.totalorder %s14_s11, 4   ;;  %s645_s7 = smov %s482_s8 }
  0xe4   : > { %s646_s8 = smov %s558_s18  ;;  %s647_s9 = smov %s490_s10 }
  0xe5   : > { %s648_s10 = smov %s650_s13  ;;  %13 = sbr.rel (!%p11_p7) target bundleno = 4 (0x4), region = 64 }
  0xea   :  { %270 = vsyncpa [#allocation3], 1 }
  0xeb   :  { %272 = vsyncpa [#allocation3 + $0x1], 1 }

</bundles_post_ra>
